<compile_context>
chip_gen: v7x
topology: tpu7x:2x2x1
jax: 0.10.0
libtpu: 0.0.40
codegen_flags: <defaults>
</compile_context>

<pallas_src>
import functools
import math

import jax
import jax.numpy as jnp
import numpy as np
from jax.experimental import pallas as pl
from jax.experimental.pallas import tpu as pltpu

LEAKY_SLOPE = 0.01
LANE = 128

_CP1 = pltpu.CompilerParams(dimension_semantics=("parallel",))


def _leaky(x):
    return jnp.where(x >= 0, x, LEAKY_SLOPE * x)


def _round_up(x, m):
    return ((x + m - 1) // m) * m


# --------------------------------------------------------------------------
# Kernels
# --------------------------------------------------------------------------
def linear_kernel(x_ref, w_ref, b_ref, o_ref):
    o_ref[...] = (jnp.dot(x_ref[...], w_ref[...], preferred_element_type=jnp.float32)
                  + b_ref[...]).astype(o_ref.dtype)


def conv_stage1_kernel(adj_ref, h_ref, a_ref, diff_ref, att_ref):
    """Fused per-batch diffusion (3 hops) + attention scores + softmax."""
    adj = adj_ref[0]                                   # (N, N)
    h = h_ref[0]                                       # (N, HP)

    # A_hat = A + I never materialized: deg = rowsum(A) + 1,
    # A_n v = dinv * (A @ (dinv * v)) + dinv^2 * v
    deg = jnp.sum(adj, axis=1, keepdims=True) + 1.0    # (N, 1)
    dinv = jax.lax.rsqrt(deg)
    dinv2 = dinv * dinv

    def step(v):
        return dinv * jnp.dot(adj, dinv * v, preferred_element_type=jnp.float32) + dinv2 * v

    v1 = step(h)
    v2 = step(v1)
    v3 = step(v2)
    hA = _leaky(v1)
    hA2 = _leaky(v2)
    hA3 = _leaky(v3)

    diff_ref[0, 0] = hA.astype(diff_ref.dtype)
    diff_ref[1, 0] = hA2.astype(diff_ref.dtype)
    diff_ref[2, 0] = hA3.astype(diff_ref.dtype)

    # e_k = relu(cat(h, h_k)) @ a  ==  relu(h) @ a[:H] + relu(h_k) @ a[H:]
    relu = lambda t: jnp.maximum(t, 0.0)
    a = a_ref[...]                                     # (HP, 2): col0=a[:H], col1=a[H:]
    rh = jnp.dot(relu(h), a[:, 0:1], preferred_element_type=jnp.float32)        # (N, 1)
    e1 = rh + jnp.dot(relu(hA), a[:, 1:2], preferred_element_type=jnp.float32)
    e2 = rh + jnp.dot(relu(hA2), a[:, 1:2], preferred_element_type=jnp.float32)
    e3 = rh + jnp.dot(relu(hA3), a[:, 1:2], preferred_element_type=jnp.float32)
    e = jnp.concatenate([e1, e2, e3], axis=-1)         # (N, 3)

    m = jnp.max(e, axis=-1, keepdims=True)             # softmax over the 3 scales
    ex = jnp.exp(e - m)
    att = ex / jnp.sum(ex, axis=-1, keepdims=True)
    att_ref[0] = att.astype(att_ref.dtype)


def conv_stage2_kernel(ss_ref, sb_ref, att_ref, h0_ref, h1_ref, h2_ref,
                       w1_ref, b1_ref, w2_ref, b2_ref, o_ref):
    """Attention application over (scrambled-gathered) h_all + two linears."""
    del ss_ref, sb_ref                                 # consumed by index_maps
    att = att_ref[0]                                   # (N, 3)
    h_prime = (att[:, 0:1] * h0_ref[0, 0]
               + att[:, 1:2] * h1_ref[0, 0]
               + att[:, 2:3] * h2_ref[0, 0]) * (1.0 / 3.0)
    x1 = _leaky(jnp.dot(h_prime, w1_ref[...], preferred_element_type=jnp.float32) + b1_ref[...])
    x2 = _leaky(jnp.dot(x1, w2_ref[...], preferred_element_type=jnp.float32) + b2_ref[...])
    o_ref[0] = x2.astype(o_ref.dtype)


def head_kernel(*refs, n_parts, nb, n_nodes):
    """mlp1 (split per hidden part, no concat) -> leaky -> mlp2 -> softmax over nodes."""
    x_refs = refs[:n_parts]
    w_refs = refs[n_parts:2 * n_parts]
    b1_ref = refs[2 * n_parts]
    w2_ref = refs[2 * n_parts + 1]
    b2_ref = refs[2 * n_parts + 2]
    o_ref = refs[2 * n_parts + 3]

    y = jnp.dot(x_refs[0][...], w_refs[0][...], preferred_element_type=jnp.float32)
    for i in range(1, n_parts):
        y = y + jnp.dot(x_refs[i][...], w_refs[i][...], preferred_element_type=jnp.float32)
    y = _leaky(y + b1_ref[...])
    z = jnp.dot(y, w2_ref[...], preferred_element_type=jnp.float32) + b2_ref[...]   # (tm, O)

    # softmax over nodes, per batch group (tile holds `nb` whole batches)
    for g in range(nb):
        zg = z[g * n_nodes:(g + 1) * n_nodes, :]
        mg = jnp.max(zg, axis=0, keepdims=True)
        eg = jnp.exp(zg - mg)
        pg = eg / jnp.sum(eg, axis=0, keepdims=True)
        o_ref[g * n_nodes:(g + 1) * n_nodes, :] = pg.astype(o_ref.dtype)


# --------------------------------------------------------------------------
# Pallas wrappers
# --------------------------------------------------------------------------
def _pick_tm(M):
    for t in (512, 256, 128):
        if M % t == 0:
            return t
    return M


def _head_tile(B, N):
    nb = max(1, min(B, max(1, 256 // max(N, 1))))
    while B % nb != 0:
        nb -= 1
    return nb * N, nb


def linear_pallas(x2d, w, b):
    M, K = x2d.shape
    Dout = w.shape[1]
    tm = _pick_tm(M)
    return pl.pallas_call(
        linear_kernel,
        out_shape=jax.ShapeDtypeStruct((M, Dout), x2d.dtype),
        grid=(M // tm,),
        in_specs=[pl.BlockSpec((tm, K), lambda i: (i, 0)),
                  pl.BlockSpec((K, Dout), lambda i: (0, 0)),
                  pl.BlockSpec((1, Dout), lambda i: (0, 0))],
        out_specs=pl.BlockSpec((tm, Dout), lambda i: (i, 0)),
        compiler_params=_CP1,
    )(x2d, w, b)


def conv_stage1_pallas(adj, h, a_mat):
    B, N, HP = h.shape
    return pl.pallas_call(
        conv_stage1_kernel,
        out_shape=(jax.ShapeDtypeStruct((3, B, N, HP), h.dtype),
                   jax.ShapeDtypeStruct((B, N, 3), h.dtype)),
        grid=(B,),
        in_specs=[pl.BlockSpec((1, N, N), lambda b: (b, 0, 0)),
                  pl.BlockSpec((1, N, HP), lambda b: (b, 0, 0)),
                  pl.BlockSpec((HP, 2), lambda b: (0, 0))],
        out_specs=(pl.BlockSpec((3, 1, N, HP), lambda b: (0, b, 0, 0)),
                   pl.BlockSpec((1, N, 3), lambda b: (b, 0, 0))),
        compiler_params=_CP1,
    )(adj, h, a_mat)


def _gather_spec(s, N, HP):
    # h_all[b, s] = diff[(3b+s)//B, (3b+s)%B]  (faithful cat(dim=0).view scramble),
    # looked up via the scalar-prefetched tables ss/sb.
    def imap(b, ss_ref, sb_ref):
        k = b * 3 + s
        return (ss_ref[k], sb_ref[k], 0, 0)
    return pl.BlockSpec((1, 1, N, HP), imap)


def conv_stage2_pallas(ss, sb, att, diff, w1, b1, w2, b2):
    _, B, N, HP = diff.shape
    grid_spec = pltpu.PrefetchScalarGridSpec(
        num_scalar_prefetch=2,
        grid=(B,),
        in_specs=[pl.BlockSpec((1, N, 3), lambda b, ss, sb: (b, 0, 0)),
                  _gather_spec(0, N, HP),
                  _gather_spec(1, N, HP),
                  _gather_spec(2, N, HP),
                  pl.BlockSpec((HP, HP), lambda b, ss, sb: (0, 0)),
                  pl.BlockSpec((1, HP), lambda b, ss, sb: (0, 0)),
                  pl.BlockSpec((HP, HP), lambda b, ss, sb: (0, 0)),
                  pl.BlockSpec((1, HP), lambda b, ss, sb: (0, 0))],
        out_specs=pl.BlockSpec((1, N, HP), lambda b, ss, sb: (b, 0, 0)),
    )
    return pl.pallas_call(
        conv_stage2_kernel,
        out_shape=jax.ShapeDtypeStruct((B, N, HP), att.dtype),
        grid_spec=grid_spec,
        compiler_params=_CP1,
    )(ss, sb, att, diff, diff, diff, w1, b1, w2, b2)


def head_pallas(hidden, w1_parts, b1, w2, b2, B, N):
    HP = hidden[0].shape[-1]
    O = w2.shape[1]
    M = B * N
    tm, nb = _head_tile(B, N)
    n_parts = len(hidden)
    xs = [h.reshape(M, HP) for h in hidden]
    in_specs = ([pl.BlockSpec((tm, HP), lambda i: (i, 0))] * n_parts
                + [pl.BlockSpec((HP, HP), lambda i: (0, 0))] * n_parts
                + [pl.BlockSpec((1, HP), lambda i: (0, 0)),
                   pl.BlockSpec((HP, O), lambda i: (0, 0)),
                   pl.BlockSpec((1, O), lambda i: (0, 0))])
    out = pl.pallas_call(
        functools.partial(head_kernel, n_parts=n_parts, nb=nb, n_nodes=N),
        out_shape=jax.ShapeDtypeStruct((M, O), hidden[0].dtype),
        grid=(M // tm,),
        in_specs=in_specs,
        out_specs=pl.BlockSpec((tm, O), lambda i: (i, 0)),
        compiler_params=_CP1,
    )(*xs, *w1_parts, b1, w2, b2)
    return out.reshape(B, N, O)


# --------------------------------------------------------------------------
# Full GNN forward (Pallas, lane-padded params) and plain-JAX reference
# --------------------------------------------------------------------------
def gnn_forward_pallas(X, adj, pparams):
    B, N, Din = X.shape

    # Static gather tables reproducing torch.cat(dim=0).view(B, 3, N, -1).
    idx = np.arange(B * 3, dtype=np.int32).reshape(B, 3)          # 3*b + s
    ss = jnp.asarray((idx // B).reshape(-1), jnp.int32)           # source scale
    sb = jnp.asarray((idx % B).reshape(-1), jnp.int32)            # source batch

    HP = pparams["in_proj_w"].shape[1]
    x0 = linear_pallas(X.reshape(B * N, Din),
                       pparams["in_proj_w"], pparams["in_proj_b"]).reshape(B, N, HP)
    hidden = [x0]
    x = x0
    for lp in pparams["convs"]:
        diff, att = conv_stage1_pallas(adj, x, lp["a_mat"])
        x = conv_stage2_pallas(ss, sb, att, diff, lp["w1"], lp["b1"], lp["w2"], lp["b2"])
        hidden.append(x)
    return head_pallas(hidden, pparams["w1_parts"], pparams["mlp1_b"],
                       pparams["mlp2_w"], pparams["mlp2_b"], B, N)


def gnn_forward_ref(X, adj, params):
    B, N, _ = X.shape
    X = X @ params["in_proj_w"] + params["in_proj_b"]
    hidden = [X]
    for lp in params["convs"]:
        h = X
        a_hat = adj + jnp.eye(N, dtype=X.dtype)[None]
        deg = jnp.sum(a_hat, axis=2)
        dinv = 1.0 / jnp.sqrt(deg)
        a_norm = dinv[:, :, None] * a_hat * dinv[:, None, :]
        v1 = a_norm @ h
        v2 = a_norm @ v1
        v3 = a_norm @ v2
        hA, hA2, hA3 = _leaky(v1), _leaky(v2), _leaky(v3)
        a_full = lp["a_full"]

        def e_of(hk):
            cat = jnp.concatenate([h, hk], axis=-1)
            return (jnp.maximum(cat, 0.0) @ a_full)[..., 0]

        e = jnp.stack([e_of(hA), e_of(hA2), e_of(hA3)], axis=1)        # (B, 3, N)
        att = jax.nn.softmax(e, axis=1)[..., None]                     # (B, 3, N, 1)
        h_all = jnp.concatenate(
            [hA[:, None], hA2[:, None], hA3[:, None]], axis=0
        ).reshape(B, 3, N, -1)                                         # faithful scramble
        h_prime = jnp.mean(att * h_all, axis=1)
        Xn = _leaky(h_prime @ lp["w1"] + lp["b1"])
        Xn = _leaky(Xn @ lp["w2"] + lp["b2"])
        X = Xn
        hidden.append(X)
    hs = jnp.concatenate(hidden, axis=-1)
    y = _leaky(hs @ params["mlp1_w"] + params["mlp1_b"])
    y = y @ params["mlp2_w"] + params["mlp2_b"]
    return jax.nn.softmax(y, axis=1)


# --------------------------------------------------------------------------
# Parameter init (synthetic, deterministic) + lane-padding for the TPU path
# --------------------------------------------------------------------------
def _init_linear(key, din, dout):
    k1, k2 = jax.random.split(key)
    lim = 1.0 / math.sqrt(din)
    w = jax.random.uniform(k1, (din, dout), jnp.float32, -lim, lim)
    b = jax.random.uniform(k2, (1, dout), jnp.float32, -lim, lim)
    return w, b


def init_params(key, input_dim, hidden_dim, output_dim, n_layers):
    keys = jax.random.split(key, 3 + n_layers)
    p = {}
    p["in_proj_w"], p["in_proj_b"] = _init_linear(keys[0], input_dim, hidden_dim)
    convs = []
    for i in range(n_layers):
        ka, k1, k2 = jax.random.split(keys[3 + i], 3)
        w1, b1 = _init_linear(k1, hidden_dim, hidden_dim)
        w2, b2 = _init_linear(k2, hidden_dim, hidden_dim)
        # module inits `a` to zeros; small random values so attention is exercised.
        a_full = 0.1 * jax.random.normal(ka, (2 * hidden_dim, 1), jnp.float32)
        convs.append(dict(w1=w1, b1=b1, w2=w2, b2=b2, a_full=a_full))
    p["convs"] = convs
    p["mlp1_w"], p["mlp1_b"] = _init_linear(keys[1], hidden_dim * (1 + n_layers), hidden_dim)
    p["mlp2_w"], p["mlp2_b"] = _init_linear(keys[2], hidden_dim, output_dim)
    return p


def _pad_to(x, shape):
    return jnp.pad(x, [(0, t - s) for s, t in zip(x.shape, shape)])


def pad_params(params, hidden_dim, n_layers):
    """Zero-pad all hidden-dim axes to a multiple of 128 lanes (exact)."""
    H = hidden_dim
    HP = _round_up(H, LANE)
    pp = {}
    pp["in_proj_w"] = _pad_to(params["in_proj_w"], (params["in_proj_w"].shape[0], HP))
    pp["in_proj_b"] = _pad_to(params["in_proj_b"], (1, HP))
    convs = []
    for lp in params["convs"]:
        a_mat = jnp.concatenate([lp["a_full"][:H], lp["a_full"][H:]], axis=1)   # (H, 2)
        convs.append(dict(
            w1=_pad_to(lp["w1"], (HP, HP)), b1=_pad_to(lp["b1"], (1, HP)),
            w2=_pad_to(lp["w2"], (HP, HP)), b2=_pad_to(lp["b2"], (1, HP)),
            a_mat=_pad_to(a_mat, (HP, 2))))
    pp["convs"] = convs
    pp["w1_parts"] = [_pad_to(params["mlp1_w"][i * H:(i + 1) * H, :], (HP, HP))
                      for i in range(1 + n_layers)]
    pp["mlp1_b"] = _pad_to(params["mlp1_b"], (1, HP))
    pp["mlp2_w"] = _pad_to(params["mlp2_w"], (HP, params["mlp2_w"].shape[1]))
    pp["mlp2_b"] = params["mlp2_b"]
    return pp


if __name__ == "__main__":
    B, N = 2, 8
    input_dim, hidden_dim, output_dim, n_layers = 4, 32, 4, 2

    key = jax.random.PRNGKey(0)
    kx, ka, kp = jax.random.split(key, 3)

    X = jax.random.normal(kx, (B, N, input_dim), jnp.float32)
    adj = (jax.random.uniform(ka, (B, N, N)) < 0.4).astype(jnp.float32)
    adj = jnp.maximum(adj, jnp.swapaxes(adj, 1, 2))          # symmetric
    adj = adj * (1.0 - jnp.eye(N, dtype=jnp.float32))        # no self loops (+I added inside)

    params = init_params(kp, input_dim, hidden_dim, output_dim, n_layers)
    pparams = pad_params(params, hidden_dim, n_layers)

    out = jax.block_until_ready(gnn_forward_pallas(X, adj, pparams))
    ref = jax.block_until_ready(gnn_forward_ref(X, adj, params))

    assert out.shape == (B, N, output_dim)
    np.testing.assert_allclose(np.asarray(out), np.asarray(ref), rtol=5e-3, atol=5e-3)
    print("KERNEL_OK")
</pallas_src>

<mosaic_0001>
module attributes {stable_mosaic.version = 11 : i64} {
  func.func @linear_kernel(%arg0: i32, %arg1: memref<16x4xf32, #tpu.memory_space<vmem>>, %arg2: memref<4x128xf32, #tpu.memory_space<vmem>>, %arg3: memref<1x128xf32, #tpu.memory_space<vmem>>, %arg4: memref<16x128xf32, #tpu.memory_space<vmem>>) attributes {dimension_semantics = [#tpu.dimension_semantics<parallel>], iteration_bounds = array<i64: 1>, scalar_prefetch = 0 : i64, scratch_operands = 0 : i64, tpu.core_type = #tpu.core_type<tc>, window_params = [{transform_indices = @transform_0, window_bounds = array<i64: 16, 4>}, {pipeline_mode = #tpu.pipeline_mode<synchronous>, transform_indices = @transform_1, window_bounds = array<i64: 4, 128>}, {pipeline_mode = #tpu.pipeline_mode<synchronous>, transform_indices = @transform_2, window_bounds = array<i64: 1, 128>}, {transform_indices = @transform_3, window_bounds = array<i64: 16, 128>}]} {
    %c0 = arith.constant 0 : index
    %c0_0 = arith.constant 0 : index
    %0 = vector.load %arg1[%c0, %c0_0] : memref<16x4xf32, #tpu.memory_space<vmem>>, vector<16x4xf32>
    %c0_1 = arith.constant 0 : index
    %c0_2 = arith.constant 0 : index
    %1 = vector.load %arg2[%c0_1, %c0_2] : memref<4x128xf32, #tpu.memory_space<vmem>>, vector<4x128xf32>
    %cst = arith.constant dense<0.000000e+00> : vector<16x128xf32>
    %2 = tpu.matmul %0, %1, %cst {dimension_numbers = #tpu.dot_dimension_numbers<[1], [0], [0], [1], [0, 0, 1, 1], [], []>} : vector<16x4xf32>, vector<4x128xf32>, vector<16x128xf32> -> vector<16x128xf32>
    %c0_3 = arith.constant 0 : index
    %c0_4 = arith.constant 0 : index
    %3 = vector.load %arg3[%c0_3, %c0_4] : memref<1x128xf32, #tpu.memory_space<vmem>>, vector<1x128xf32>
    %4 = vector.broadcast %3 : vector<1x128xf32> to vector<16x128xf32>
    %5 = arith.addf %2, %4 : vector<16x128xf32>
    %c0_5 = arith.constant 0 : index
    %c0_6 = arith.constant 0 : index
    %6 = vector.load %arg4[%c0_5, %c0_6] : memref<16x128xf32, #tpu.memory_space<vmem>>, vector<16x128xf32>
    tpu.vector_store %arg4[%c0_5, %c0_6], %5 {strides = array<i32>} : memref<16x128xf32, #tpu.memory_space<vmem>>, vector<16x128xf32>,
    return
  }
  func.func @transform_0(%arg0: i32) -> (i32, i32) {
    %c0_i32 = arith.constant 0 : i32
    %c0_i32_0 = arith.constant 0 : i32
    return %arg0, %c0_i32 : i32, i32
  }
  func.func @transform_1(%arg0: i32) -> (i32, i32) {
    %c0_i32 = arith.constant 0 : i32
    %c0_i32_0 = arith.constant 0 : i32
    %c0_i32_1 = arith.constant 0 : i32
    return %c0_i32, %c0_i32_0 : i32, i32
  }
  func.func @transform_2(%arg0: i32) -> (i32, i32) {
    %c0_i32 = arith.constant 0 : i32
    %c0_i32_0 = arith.constant 0 : i32
    %c0_i32_1 = arith.constant 0 : i32
    return %c0_i32, %c0_i32_0 : i32, i32
  }
  func.func @transform_3(%arg0: i32) -> (i32, i32) {
    %c0_i32 = arith.constant 0 : i32
    %c0_i32_0 = arith.constant 0 : i32
    return %arg0, %c0_i32 : i32, i32
  }
}

</mosaic_0001>

<bundles_post_ra>
// kernel: tpu_custom_call.1
= control target key start
LH: loop header
LB: loop body
LE: loop exit
PB: predicated region body
PF: predicated region fallthrough
CT: control target
= control target key end

     0   :  { %vm32_vm0 = vcmask 1043456   ;;  %vm25_vm1 = vcmask 31744   ;;  %s215_s0 = inlined_call_operand.vmem [shape: f32[16,4], index: 0, kind: input, shape index: {}]   ;;  %s216_s1 = inlined_call_operand.vmem [shape: f32[4,128], index: 1, kind: input, shape index: {}]   ;;  %s217_s2 = inlined_call_operand.vmem [shape: f32[1,128], index: 2, kind: input, shape index: {}]   ;;  %s218_s3 = inlined_call_operand.hbm [shape: f32[16,128], index: 3, kind: output, shape index: {}]  }
   0x1   :  { %v17_v0 = vld [vmem:[%s216_s1] sm:$0xf]  ;;  %v16_v2 = vld [vmem:[%s215_s0 + $0x8] sm:$0xff] }
   0x2   :  { %v15_v1 = vld [vmem:[%s215_s0] sm:$0xff]  ;;  %136 = vmatprep.subr.msk.mxu0 %vm32_vm0, %v17_v0 }
   0x3   :  { %138 = vmatprep.mubr.msk.f32.mxu0 %vm25_vm1, %v15_v1 }
   0x4   :  { %8 = vsyncpa [#allocation3], 0  ;;  %137 = vmatpush3.msk.msra.mxu0 %vm32_vm0, %v17_v0  ;;  %v129_v3 = vld [vmem:[%s217_s2] ss:$0 sm:$0xff]  ;;  %s168_s1 = smov [#allocation2]  }
   0x5   :  { %139 = vmatmul.mubr.msk.f32.vlgmr.msra.gmra.mrb[0].mxu0 %vm25_vm1, %v16_v2  ;;  %s118_s20 = sshll.u32 %s168_s1, 4  ;;  %s119_s20 = int_to_ptr.vmem [resolvable:$true] %s118_s20 }
   0x6   :  { %s144_s21 = scalar_lea.vmem %s119_s20, 256  ;;  %p149_p1 = scmp.lt.s32.totalorder %s119_s20, %s119_s20 }
   0x7   :  { %p145_p0 = scmp.ne.s32.totalorder %s119_s20, %s144_s21  ;;  %p150_p2 = scmp.lt.s32.totalorder %s144_s21, %s144_s21 }
   0x9   :  { %p151_p3 = por %p150_p2, %p149_p1 }
   0xb   :  { %p152_p4 = pnand %p151_p3, %p145_p0 }
  0xd8   :  { %v140_v4 = vpop.f32.mrb[0].mxu0 }
  0xd9   :  { %v108_v5 = vadd.f32 %v140_v4, %v129_v3  ;;  %v102_v6 = vpop.f32.mrb[1].mxu0 }
  0xda   :  { %v103_v7 = vadd.f32 %v129_v3, %v102_v6 }
  0xdb   :  { %112 = vst [vmem:[#allocation2 + $0x8] sm:$0xff] %v108_v5 }
  0xdc   :  { %111 = vst [vmem:[#allocation2] sm:$0xff] %v103_v7 }
  0xdd   :  { %155 = shalt.err (!%p152_p4)
}
  0xde   :  { %s156_s2 = scalar_lea.hbm %s218_s3, 256 }
  0xdf   :  { %p157_p5 = scmp.ne.s32.totalorder %s218_s3, %s156_s2  ;;  %p160_p6 = scmp.lt.u32.totalorder %s156_s2, %s218_s3 }
  0xe1   :  { %p162_p7 = pnand %p160_p6, %p157_p5 }
  0xe3   :  { %165 = shalt.err (!%p162_p7)
}
  0xe4   :  { %s169_s27 = smov 128   ;;  %s170_s28 = smov 8  }
  0xe5   :  { %124 = dma.vmem_to_hbm [thread:$0]  %s119_s20, 256, %s218_s3, [#allocation3], %s169_s27, %s169_s27, %s170_s28  }
  0xe6   :  { %166 = dma.done.wait [#allocation3], 256  }
  0xe7   :  { %167 = vsyncadd [#allocation3], 4294967040 }
  0xe8   :  { %128 = vsyncpa [#allocation3], 1 }

</bundles_post_ra>
